<compile_context>
chip_gen: v5e
topology: v5e:2x2
jax: 0.10.0
libtpu: 0.0.40
codegen_flags: <defaults>
</compile_context>

<pallas_src>
import jax
import jax.numpy as jnp
from jax.experimental import pallas as pl
from jax.experimental.pallas import tpu as pltpu


def _round_up(x, m):
    return ((x + m - 1) // m) * m


def _generator_kernel(z_ref, w1_ref, b1_ref, w2_ref, b2_ref, w3_ref, b3_ref, o_ref):
    cdt = w1_ref.dtype  # MXU compute dtype (bf16 by default)

    # Hoist bias loads/broadcasts once (JAX does not CSE broadcast_in_dim).
    b1 = b1_ref[...]
    b2 = b2_ref[...]
    b3 = b3_ref[...]

    # Layer 1: Linear + ReLU.  z tile arrives as f32; the (tm, latent) cast is
    # a cheap VPU op hidden under DMA.  K = latent_dim (no K padding).
    h1 = jnp.dot(z_ref[...].astype(cdt), w1_ref[...],
                 preferred_element_type=jnp.float32)
    h1 = jnp.maximum(h1 + b1, 0.0)

    # Layer 2: Linear + ReLU
    h2 = jnp.dot(h1.astype(cdt), w2_ref[...],
                 preferred_element_type=jnp.float32)
    h2 = jnp.maximum(h2 + b2, 0.0)

    # Layer 3: Linear + Tanh (tanh stays f32 on the EUP)
    h3 = jnp.dot(h2.astype(cdt), w3_ref[...],
                 preferred_element_type=jnp.float32)
    o_ref[...] = jnp.tanh(h3 + b3).astype(o_ref.dtype)


def generator_forward(z, params, *, tile_m=2048, compute_dtype=jnp.bfloat16,
                      out_dtype=jnp.float32):
    """Generator MLP forward pass as a batch-tiled Pallas TPU kernel.

    z:      (B, latent_dim) float32
    params: dict with w1 (latent_dim,128), b1 (1,128),
                      w2 (128,256),        b2 (1,256),
                      w3 (256,output_dim), b3 (1,output_dim)   (all float32)
    returns (B, output_dim) in `out_dtype` (float32 by default).
    """
    B, latent_dim = z.shape
    hidden1 = params["w1"].shape[1]   # 128
    hidden2 = params["w2"].shape[1]   # 256
    output_dim = params["w3"].shape[1]

    # --- Lane-dense output: zero-pad w3/b3 COLUMNS (resident, negligible) so
    #     the kernel's output block last dim is a multiple of 128; padded
    #     columns produce tanh(0)=0 and are sliced off outside.
    n_pad = (-output_dim) % 128
    w3 = params["w3"]
    b3 = params["b3"]
    if n_pad:
        w3 = jnp.pad(w3, ((0, 0), (0, n_pad)))
        b3 = jnp.pad(b3, ((0, 0), (0, n_pad)))
    outp = output_dim + n_pad

    out_isz = jnp.dtype(out_dtype).itemsize

    # --- Row tile: large to amortize per-grid-step overhead, but keep ~8 grid
    #     steps (v7x megacore: >=4 per TensorCore) and fit v7x VMEM (64 MiB).
    tm = min(int(tile_m), max(8, _round_up(pl.cdiv(B, 8), 8)))

    def vmem_est(t):
        io = 2 * t * latent_dim * 4 + 2 * t * outp * out_isz       # dbl-buffered I/O
        inter = t * (hidden1 + hidden2 + outp) * 6                  # f32 + bf16 temps
        wb = (latent_dim * hidden1 + hidden1 * hidden2 + hidden2 * outp) * 2 \
             + (hidden1 + hidden2 + outp) * 4
        return io + inter + wb

    while tm > 8 and vmem_est(tm) > 40 * 1024 * 1024:
        tm = max(8, _round_up(tm // 2, 8))

    # Ragged last tile: Pallas masks out-of-range rows on store; garbage rows
    # in the input buffer only affect their own (discarded) output rows.
    grid = (pl.cdiv(B, tm),)

    # Tiny resident weights: cast to MXU dtype once; biases stay f32.
    w1c = params["w1"].astype(compute_dtype)
    w2c = params["w2"].astype(compute_dtype)
    w3c = w3.astype(compute_dtype)
    b1, b2 = params["b1"], params["b2"]

    weight_bytes = sum(int(a.size) * a.dtype.itemsize
                       for a in (w1c, w2c, w3c, b1, b2, b3))
    cost = pl.CostEstimate(
        flops=2 * B * (latent_dim * hidden1 + hidden1 * hidden2 + hidden2 * outp),
        transcendentals=B * outp,
        bytes_accessed=B * latent_dim * 4 + B * outp * out_isz + weight_bytes,
    )

    # Resident blocks: same index every grid step; single-buffered.
    def wspec(shape):
        return pl.BlockSpec(shape, lambda i: (0, 0), pipeline_mode=pl.Buffered(1))

    out = pl.pallas_call(
        _generator_kernel,
        out_shape=jax.ShapeDtypeStruct((B, outp), out_dtype),
        grid_spec=pltpu.PrefetchScalarGridSpec(
            num_scalar_prefetch=0,
            grid=grid,
            in_specs=[
                pl.BlockSpec((tm, latent_dim), lambda i: (i, 0)),   # z tile (f32)
                wspec((latent_dim, hidden1)),                        # w1
                wspec((1, hidden1)),                                 # b1
                wspec((hidden1, hidden2)),                           # w2
                wspec((1, hidden2)),                                 # b2
                wspec((hidden2, outp)),                              # w3
                wspec((1, outp)),                                    # b3
            ],
            out_specs=pl.BlockSpec((tm, outp), lambda i: (i, 0)),
        ),
        compiler_params=pltpu.CompilerParams(
            dimension_semantics=("parallel",),       # megacore-shard batch on v7x
            vmem_limit_bytes=48 * 1024 * 1024,       # safe on v7x (64 MiB physical)
        ),
        cost_estimate=cost,
    )(z, w1c, b1, w2c, b2, w3c, b3)

    if n_pad:
        out = out[:, :output_dim]
    return out


def init_generator_params(key, latent_dim, output_dim):
    """Deterministic init mirroring nn.Linear's uniform(-1/sqrt(fan_in), +)."""
    dims = [(latent_dim, 128), (128, 256), (256, output_dim)]
    params = {}
    for i, (fan_in, fan_out) in enumerate(dims, start=1):
        key, kw, kb = jax.random.split(key, 3)
        bound = 1.0 / jnp.sqrt(jnp.float32(fan_in))
        params[f"w{i}"] = jax.random.uniform(
            kw, (fan_in, fan_out), jnp.float32, minval=-bound, maxval=bound
        )
        params[f"b{i}"] = jax.random.uniform(
            kb, (1, fan_out), jnp.float32, minval=-bound, maxval=bound
        )
    return params


def generator_reference(z, params, compute_dtype=jnp.bfloat16):
    """Pure-JAX reference mirroring the kernel's bf16-operand/f32-accum math."""
    cdt = compute_dtype
    h = jnp.dot(z.astype(cdt), params["w1"].astype(cdt),
                preferred_element_type=jnp.float32)
    h = jnp.maximum(h + params["b1"], 0.0)
    h = jnp.dot(h.astype(cdt), params["w2"].astype(cdt),
                preferred_element_type=jnp.float32)
    h = jnp.maximum(h + params["b2"], 0.0)
    h = jnp.dot(h.astype(cdt), params["w3"].astype(cdt),
                preferred_element_type=jnp.float32)
    return jnp.tanh(h + params["b3"])


if __name__ == "__main__":
    latent_dim = 32
    output_dim = 256   # e.g. a flattened 16x16 image
    batch = 8          # small demo batch; large batches use up to TM=2048 tiles

    key = jax.random.PRNGKey(0)
    key, kz = jax.random.split(key)
    z = jax.random.normal(kz, (batch, latent_dim), dtype=jnp.float32)
    params = init_generator_params(key, latent_dim, output_dim)

    out = jax.block_until_ready(generator_forward(z, params))
    ref = generator_reference(z, params)
    assert out.shape == (batch, output_dim)
    assert jnp.allclose(out, ref, atol=1e-3, rtol=1e-3), "mismatch vs bf16 reference"

    # Loose sanity check against the full-f32 PyTorch-equivalent math.
    ref_f32 = generator_reference(z, params, compute_dtype=jnp.float32)
    assert jnp.allclose(out, ref_f32, atol=3e-2, rtol=3e-2), "bf16 drift too large"

    # Ragged batch (B % tm != 0) exercises the in-kernel partial last tile
    # (no host-side pad / slice anymore).
    z13 = jax.random.normal(jax.random.PRNGKey(1), (13, latent_dim), jnp.float32)
    out13 = jax.block_until_ready(generator_forward(z13, params))
    ref13 = generator_reference(z13, params)
    assert out13.shape == (13, output_dim)
    assert jnp.allclose(out13, ref13, atol=1e-3, rtol=1e-3), "ragged-batch mismatch"

    print("KERNEL_OK")
</pallas_src>

<mosaic_0001>
module attributes {stable_mosaic.version = 11 : i64} {
  func.func @_generator_kernel(%arg0: i32, %arg1: memref<8x32xf32, #tpu.memory_space<vmem>>, %arg2: memref<32x128xbf16, #tpu.memory_space<vmem>>, %arg3: memref<1x128xf32, #tpu.memory_space<vmem>>, %arg4: memref<128x256xbf16, #tpu.memory_space<vmem>>, %arg5: memref<1x256xf32, #tpu.memory_space<vmem>>, %arg6: memref<256x256xbf16, #tpu.memory_space<vmem>>, %arg7: memref<1x256xf32, #tpu.memory_space<vmem>>, %arg8: memref<8x256xf32, #tpu.memory_space<vmem>>) attributes {dimension_semantics = [#tpu.dimension_semantics<parallel>], iteration_bounds = array<i64: 1>, scalar_prefetch = 0 : i64, scratch_operands = 0 : i64, tpu.core_type = #tpu.core_type<tc>, window_params = [{transform_indices = @transform_0, window_bounds = array<i64: 8, 32>}, {pipeline_mode = #tpu.pipeline_mode<synchronous>, transform_indices = @transform_1, window_bounds = array<i64: 32, 128>}, {pipeline_mode = #tpu.pipeline_mode<synchronous>, transform_indices = @transform_2, window_bounds = array<i64: 1, 128>}, {pipeline_mode = #tpu.pipeline_mode<synchronous>, transform_indices = @transform_3, window_bounds = array<i64: 128, 256>}, {pipeline_mode = #tpu.pipeline_mode<synchronous>, transform_indices = @transform_4, window_bounds = array<i64: 1, 256>}, {pipeline_mode = #tpu.pipeline_mode<synchronous>, transform_indices = @transform_5, window_bounds = array<i64: 256, 256>}, {pipeline_mode = #tpu.pipeline_mode<synchronous>, transform_indices = @transform_6, window_bounds = array<i64: 1, 256>}, {transform_indices = @transform_7, window_bounds = array<i64: 8, 256>}]} {
    %c0 = arith.constant 0 : index
    %c0_0 = arith.constant 0 : index
    %0 = vector.load %arg3[%c0, %c0_0] : memref<1x128xf32, #tpu.memory_space<vmem>>, vector<1x128xf32>
    %c0_1 = arith.constant 0 : index
    %c0_2 = arith.constant 0 : index
    %1 = vector.load %arg5[%c0_1, %c0_2] : memref<1x256xf32, #tpu.memory_space<vmem>>, vector<1x256xf32>
    %c0_3 = arith.constant 0 : index
    %c0_4 = arith.constant 0 : index
    %2 = vector.load %arg7[%c0_3, %c0_4] : memref<1x256xf32, #tpu.memory_space<vmem>>, vector<1x256xf32>
    %c0_5 = arith.constant 0 : index
    %c0_6 = arith.constant 0 : index
    %3 = vector.load %arg1[%c0_5, %c0_6] : memref<8x32xf32, #tpu.memory_space<vmem>>, vector<8x32xf32>
    %4 = arith.truncf %3 : vector<8x32xf32> to vector<8x32xbf16>
    %c0_7 = arith.constant 0 : index
    %c0_8 = arith.constant 0 : index
    %5 = vector.load %arg2[%c0_7, %c0_8] : memref<32x128xbf16, #tpu.memory_space<vmem>>, vector<32x128xbf16>
    %cst = arith.constant dense<0.000000e+00> : vector<8x128xf32>
    %6 = tpu.matmul %4, %5, %cst {dimension_numbers = #tpu.dot_dimension_numbers<[1], [0], [0], [1], [0, 0, 1, 1], [], []>} : vector<8x32xbf16>, vector<32x128xbf16>, vector<8x128xf32> -> vector<8x128xf32>
    %7 = vector.broadcast %0 : vector<1x128xf32> to vector<8x128xf32>
    %8 = arith.addf %6, %7 : vector<8x128xf32>
    %cst_9 = arith.constant 0.000000e+00 : f32
    %9 = vector.broadcast %cst_9 : f32 to vector<8x128xf32>
    %10 = arith.maximumf %8, %9 : vector<8x128xf32>
    %11 = arith.truncf %10 : vector<8x128xf32> to vector<8x128xbf16>
    %c0_10 = arith.constant 0 : index
    %c0_11 = arith.constant 0 : index
    %12 = vector.load %arg4[%c0_10, %c0_11] : memref<128x256xbf16, #tpu.memory_space<vmem>>, vector<128x256xbf16>
    %cst_12 = arith.constant dense<0.000000e+00> : vector<8x256xf32>
    %13 = tpu.matmul %11, %12, %cst_12 {dimension_numbers = #tpu.dot_dimension_numbers<[1], [0], [0], [1], [0, 0, 1, 1], [], []>} : vector<8x128xbf16>, vector<128x256xbf16>, vector<8x256xf32> -> vector<8x256xf32>
    %14 = vector.broadcast %1 : vector<1x256xf32> to vector<8x256xf32>
    %15 = arith.addf %13, %14 : vector<8x256xf32>
    %cst_13 = arith.constant 0.000000e+00 : f32
    %16 = vector.broadcast %cst_13 : f32 to vector<8x256xf32>
    %17 = arith.maximumf %15, %16 : vector<8x256xf32>
    %18 = arith.truncf %17 : vector<8x256xf32> to vector<8x256xbf16>
    %c0_14 = arith.constant 0 : index
    %c0_15 = arith.constant 0 : index
    %19 = vector.load %arg6[%c0_14, %c0_15] : memref<256x256xbf16, #tpu.memory_space<vmem>>, vector<256x256xbf16>
    %cst_16 = arith.constant dense<0.000000e+00> : vector<8x256xf32>
    %20 = tpu.matmul %18, %19, %cst_16 {dimension_numbers = #tpu.dot_dimension_numbers<[1], [0], [0], [1], [0, 0, 1, 1], [], []>} : vector<8x256xbf16>, vector<256x256xbf16>, vector<8x256xf32> -> vector<8x256xf32>
    %21 = vector.broadcast %2 : vector<1x256xf32> to vector<8x256xf32>
    %22 = arith.addf %20, %21 : vector<8x256xf32>
    %23 = math.tanh %22 : vector<8x256xf32>
    %c0_17 = arith.constant 0 : index
    %c0_18 = arith.constant 0 : index
    %24 = vector.load %arg8[%c0_17, %c0_18] : memref<8x256xf32, #tpu.memory_space<vmem>>, vector<8x256xf32>
    tpu.vector_store %arg8[%c0_17, %c0_18], %23 {strides = array<i32>} : memref<8x256xf32, #tpu.memory_space<vmem>>, vector<8x256xf32>,
    return
  }
  func.func @transform_0(%arg0: i32) -> (i32, i32) {
    %c0_i32 = arith.constant 0 : i32
    %c0_i32_0 = arith.constant 0 : i32
    return %arg0, %c0_i32 : i32, i32
  }
  func.func @transform_1(%arg0: i32) -> (i32, i32) {
    %c0_i32 = arith.constant 0 : i32
    %c0_i32_0 = arith.constant 0 : i32
    %c0_i32_1 = arith.constant 0 : i32
    return %c0_i32, %c0_i32_0 : i32, i32
  }
  func.func @transform_2(%arg0: i32) -> (i32, i32) {
    %c0_i32 = arith.constant 0 : i32
    %c0_i32_0 = arith.constant 0 : i32
    %c0_i32_1 = arith.constant 0 : i32
    return %c0_i32, %c0_i32_0 : i32, i32
  }
  func.func @transform_3(%arg0: i32) -> (i32, i32) {
    %c0_i32 = arith.constant 0 : i32
    %c0_i32_0 = arith.constant 0 : i32
    %c0_i32_1 = arith.constant 0 : i32
    return %c0_i32, %c0_i32_0 : i32, i32
  }
  func.func @transform_4(%arg0: i32) -> (i32, i32) {
    %c0_i32 = arith.constant 0 : i32
    %c0_i32_0 = arith.constant 0 : i32
    %c0_i32_1 = arith.constant 0 : i32
    return %c0_i32, %c0_i32_0 : i32, i32
  }
  func.func @transform_5(%arg0: i32) -> (i32, i32) {
    %c0_i32 = arith.constant 0 : i32
    %c0_i32_0 = arith.constant 0 : i32
    %c0_i32_1 = arith.constant 0 : i32
    return %c0_i32, %c0_i32_0 : i32, i32
  }
  func.func @transform_6(%arg0: i32) -> (i32, i32) {
    %c0_i32 = arith.constant 0 : i32
    %c0_i32_0 = arith.constant 0 : i32
    %c0_i32_1 = arith.constant 0 : i32
    return %c0_i32, %c0_i32_0 : i32, i32
  }
  func.func @transform_7(%arg0: i32) -> (i32, i32) {
    %c0_i32 = arith.constant 0 : i32
    %c0_i32_0 = arith.constant 0 : i32
    return %arg0, %c0_i32 : i32, i32
  }
}

</mosaic_0001>

<bundles_post_ra>
// kernel: tpu_custom_call.1
= control target key start
LH: loop header
LB: loop body
LE: loop exit
PB: predicated region body
PF: predicated region fallthrough
CT: control target
= control target key end

     0   :  { %12 = vsyncpa [#allocation3], 0  ;;  %s1040_s0 = inlined_call_operand.hbm [shape: f32[8,32], index: 0, kind: input, shape index: {}]   ;;  %s1041_s1 = inlined_call_operand.hbm [shape: bf16[32,128], index: 1, kind: input, shape index: {}]   ;;  %s1042_s2 = inlined_call_operand.hbm [shape: f32[1,128], index: 2, kind: input, shape index: {}]   ;;  %s1043_s3 = inlined_call_operand.hbm [shape: bf16[128,256], index: 3, kind: input, shape index: {}]   ;;  %s1044_s4 = inlined_call_operand.vmem [shape: f32[1,256], index: 4, kind: input, shape index: {}]   ;;  %s1045_s5 = inlined_call_operand.hbm [shape: bf16[256,256], index: 5, kind: input, shape index: {}]   ;;  %s1046_s6 = inlined_call_operand.vmem [shape: f32[1,256], index: 6, kind: input, shape index: {}]   ;;  %s1047_s7 = inlined_call_operand.hbm [shape: f32[8,256], index: 7, kind: output, shape index: {}]  }
   0x1   :  { %13 = vsyncpa [#allocation6], 0 }
   0x2   :  { %14 = vsyncpa [#allocation9], 0  ;;  %s31_s26 = sshll.u32 %s1041_s1, 4  ;;  %s32_s26 = int_to_ptr.hbm [resolvable:$true] %s31_s26 }
   0x3   :  { %15 = vsyncpa [#allocation4], 0  ;;  %s966_s27 = smov [#allocation5]   ;;  %s55_s8 = sshll.u32 %s1043_s3, 4  ;;  %s56_s8 = int_to_ptr.hbm [resolvable:$true] %s55_s8 }
   0x4   :  { %s33_s28 = sshll.u32 %s966_s27, 4  ;;  %s967_s9 = smov 64   ;;  %s34_s28 = int_to_ptr.vmem [resolvable:$true] %s33_s28 }
   0x5   :  { %s968_s10 = smov 4   ;;  %s969_s11 = smov [#allocation8]  }
   0x6   :  { %39 = dma.hbm_to_vmem [thread:$0]  %s32_s26, 256, %s34_s28, [#allocation6], %s967_s9, %s967_s9, %s968_s10  }
   0x7   :  { %s57_s12 = sshll.u32 %s969_s11, 4  ;;  %s970_s13 = smov 128   ;;  %s58_s12 = int_to_ptr.vmem [resolvable:$true] %s57_s12 }
   0x8   :  { %s971_s14 = smov 8   ;;  %s21_s16 = sshll.u32 %s1040_s0, 4  ;;  %s22_s16 = int_to_ptr.hbm [resolvable:$true] %s21_s16 }
   0x9   :  { %63 = dma.hbm_to_vmem [thread:$0]  %s56_s8, 2048, %s58_s12, [#allocation9], %s970_s13, %s970_s13, %s971_s14  }
   0xa   :  { %s972_s17 = smov [#allocation2]   ;;  %s45_s20 = sshll.u32 %s1042_s2, 4  ;;  %s46_s20 = int_to_ptr.hbm [resolvable:$true] %s45_s20 }
   0xb   :  { %s23_s18 = sshll.u32 %s972_s17, 4  ;;  %s973_s21 = smov [#allocation7]   ;;  %s24_s18 = int_to_ptr.vmem [resolvable:$true] %s23_s18 }
   0xc   :  { %26 = dma.hbm_to_vmem [thread:$0]  %s22_s16, 128, %s24_s18, [#allocation3]  }
   0xd   :  { %s47_s22 = sshll.u32 %s973_s21, 4  ;;  %s70_s25 = sshll.u32 %s1045_s5, 4  ;;  %s48_s22 = int_to_ptr.vmem [resolvable:$true] %s47_s22  ;;  %s71_s25 = int_to_ptr.hbm [resolvable:$true] %s70_s25 }
   0xe   :  { %50 = dma.hbm_to_vmem [thread:$0]  %s46_s20, 16, %s48_s22, [#allocation6]  }
   0xf   :  { %s974_s0 = smov [#allocation10]  }
  0x10   :  { %s72_s26 = sshll.u32 %s974_s0, 4  ;;  %s73_s26 = int_to_ptr.vmem [resolvable:$true] %s72_s26 }
  0x11   :  { %78 = dma.hbm_to_vmem [thread:$0]  %s71_s25, 4096, %s73_s26, [#allocation9], %s970_s13, %s970_s13, %s971_s14  }
  0x12   :  { %958 = dma.done.wait [#allocation3], 128  }
  0x13   :  { %959 = vsyncadd [#allocation3], 4294967168 }
  0x14   :  { %960 = dma.done.wait [#allocation6], 272  }
  0x15   :  { %961 = vsyncadd [#allocation6], 4294967024 }
  0x16   :  { %962 = dma.done.wait [#allocation9], 6144  }
  0x17   :  { %963 = vsyncadd [#allocation9], 4294961152  ;;  %v750_v0 = vld [vmem:[#allocation5 + $0x8] sm:$0xff]  ;;  %v749_v1 = vld [vmem:[#allocation5] sm:$0xff]  ;;  %vm126_vm0 = vcmask 261120  }
  0x18   :  { %v105_v2 = vld [vmem:[#allocation2] sm:$0xff]  ;;  %v615_v3 = vld [vmem:[#allocation8 + $0x70] sm:$0xf]  ;;  %v766_v4 = vld [vmem:[#allocation8 + $0x74] sm:$0xf0]  ;;  %136 = vmatpush.bf16.msra.mxu0 %v750_v0 }
  0x19   :  { %v765_v5 = vld [vmem:[#allocation8 + $0x74] sm:$0xf]  ;;  %v616_v6 = vor.u32 %v766_v4, %v615_v3  ;;  %v617_v7 = vld [vmem:[#allocation8 + $0x78] sm:$0xf0]  ;;  %v607_v8 = vld [vmem:[#allocation8 + $0x60] sm:$0xf]  ;;  %v106_v14 = vpack.c.bf16 %v105_v2, %v105_v2 }
  0x1a   :  { %v764_v9 = vld [vmem:[#allocation8 + $0x64] sm:$0xf0]  ;;  %v620_v10 = vor.u32 %v765_v5, %v617_v7  ;;  %v763_v11 = vld [vmem:[#allocation8 + $0x64] sm:$0xf]  ;;  %v609_v12 = vld [vmem:[#allocation8 + $0x68] sm:$0xf0] }
  0x1b   :  { %246 = vmatpush.bf16.msra.mxu1 %v616_v6  ;;  %v608_v13 = vor.u32 %v764_v9, %v607_v8  ;;  %v612_v15 = vor.u32 %v763_v11, %v609_v12  ;;  %v599_v16 = vld [vmem:[#allocation8 + $0x50] sm:$0xf]  ;;  %v762_v17 = vld [vmem:[#allocation8 + $0x54] sm:$0xf0]  ;;  %v761_v18 = vld [vmem:[#allocation8 + $0x54] sm:$0xf] }
  0x1c   :  { %259 = vmatpush.bf16.msra.mxu2 %v620_v10  ;;  %137 = vmatpush.bf16.msra.mxu0 %v749_v1  ;;  %v601_v19 = vld [vmem:[#allocation8 + $0x58] sm:$0xf0]  ;;  %v600_v20 = vor.u32 %v762_v17, %v599_v16  ;;  %v591_v22 = vld [vmem:[#allocation8 + $0x40] sm:$0xf]  ;;  %v760_v23 = vld [vmem:[#allocation8 + $0x44] sm:$0xf0] }
  0x1d   :  { %v604_v21 = vor.u32 %v761_v18, %v601_v19  ;;  %v759_v24 = vld [vmem:[#allocation8 + $0x44] sm:$0xf]  ;;  %v593_v25 = vld [vmem:[#allocation8 + $0x48] sm:$0xf0]  ;;  %v592_v26 = vor.u32 %v760_v23, %v591_v22  ;;  %v583_v28 = vld [vmem:[#allocation8 + $0x30] sm:$0xf] }
  0x1e   :  { %v596_v27 = vor.u32 %v759_v24, %v593_v25  ;;  %v758_v29 = vld [vmem:[#allocation8 + $0x34] sm:$0xf0]  ;;  %v757_v30 = vld [vmem:[#allocation8 + $0x34] sm:$0xf]  ;;  %v585_v31 = vld [vmem:[#allocation8 + $0x38] sm:$0xf0] }
  0x1f   :  { %247 = vmatpush.bf16.msra.mxu1 %v608_v13  ;;  %556 = vmatmul.msk.bf16.vlgmr.msra.gmra.mxu0 %vm126_vm0, %v106_v14  ;;  %v584_v32 = vor.u32 %v758_v29, %v583_v28  ;;  %v588_v33 = vor.u32 %v757_v30, %v585_v31  ;;  %v575_v34 = vld [vmem:[#allocation8 + $0x20] sm:$0xf]  ;;  %v756_v35 = vld [vmem:[#allocation8 + $0x24] sm:$0xf0]  ;;  %v755_v36 = vld [vmem:[#allocation8 + $0x24] sm:$0xf] }
  0x20   :  { %260 = vmatpush.bf16.msra.mxu2 %v612_v15  ;;  %v577_v37 = vld [vmem:[#allocation8 + $0x28] sm:$0xf0]  ;;  %v576_v38 = vor.u32 %v756_v35, %v575_v34  ;;  %v567_v40 = vld [vmem:[#allocation8 + $0x10] sm:$0xf]  ;;  %v754_v41 = vld [vmem:[#allocation8 + $0x14] sm:$0xf0] }
  0x21   :  { %v580_v39 = vor.u32 %v755_v36, %v577_v37  ;;  %v753_v42 = vld [vmem:[#allocation8 + $0x14] sm:$0xf]  ;;  %v568_v43 = vor.u32 %v754_v41, %v567_v40  ;;  %v569_v44 = vld [vmem:[#allocation8 + $0x18] sm:$0xf0]  ;;  %v559_v46 = vld [vmem:[#allocation8] sm:$0xf] }
  0x22   :  { %v572_v45 = vor.u32 %v753_v42, %v569_v44  ;;  %v752_v47 = vld [vmem:[#allocation8 + $0x4] sm:$0xf0]  ;;  %v751_v48 = vld [vmem:[#allocation8 + $0x4] sm:$0xf]  ;;  %v561_v50 = vld [vmem:[#allocation8 + $0x8] sm:$0xf0] }
  0x23   :  { %248 = vmatpush.bf16.msra.mxu1 %v600_v20  ;;  %v560_v49 = vor.u32 %v752_v47, %v559_v46  ;;  %v564_v51 = vor.u32 %v751_v48, %v561_v50  ;;  %v679_v52 = vld [vmem:[#allocation10 + $0x70] sm:$0xf]  ;;  %v782_v53 = vld [vmem:[#allocation10 + $0x74] sm:$0xf0]  ;;  %v781_v54 = vld [vmem:[#allocation10 + $0x74] sm:$0xf] }
  0x24   :  { %261 = vmatpush.bf16.msra.mxu2 %v604_v21  ;;  %v680_v55 = vor.u32 %v782_v53, %v679_v52  ;;  %v681_v56 = vld [vmem:[#allocation10 + $0x78] sm:$0xf0]  ;;  %v671_v57 = vld [vmem:[#allocation10 + $0x60] sm:$0xf]  ;;  %v780_v58 = vld [vmem:[#allocation10 + $0x64] sm:$0xf0] }
  0x25   :  { %v684_v59 = vor.u32 %v781_v54, %v681_v56  ;;  %v779_v60 = vld [vmem:[#allocation10 + $0x64] sm:$0xf]  ;;  %v673_v61 = vld [vmem:[#allocation10 + $0x68] sm:$0xf0]  ;;  %v743_v62 = vld [vmem:[#allocation10 + $0xf0] sm:$0xf]  ;;  %v672_v63 = vor.u32 %v780_v58, %v671_v57 }
  0x26   :  { %473 = vmatpush.bf16.msra.mxu3 %v680_v55  ;;  %v798_v0 = vld [vmem:[#allocation10 + $0xf4] sm:$0xf0]  ;;  %v797_v1 = vld [vmem:[#allocation10 + $0xf4] sm:$0xf]  ;;  %v745_v2 = vld [vmem:[#allocation10 + $0xf8] sm:$0xf0]  ;;  %v676_v3 = vor.u32 %v779_v60, %v673_v61 }
  0x27   :  { %249 = vmatpush.bf16.msra.mxu1 %v592_v26  ;;  %v744_v4 = vor.u32 %v798_v0, %v743_v62  ;;  %v748_v5 = vor.u32 %v797_v1, %v745_v2  ;;  %v663_v6 = vld [vmem:[#allocation10 + $0x50] sm:$0xf]  ;;  %v778_v7 = vld [vmem:[#allocation10 + $0x54] sm:$0xf0]  ;;  %v777_v8 = vld [vmem:[#allocation10 + $0x54] sm:$0xf] }
  0x28   :  { %262 = vmatpush.bf16.msra.mxu2 %v596_v27  ;;  %v665_v9 = vld [vmem:[#allocation10 + $0x58] sm:$0xf0]  ;;  %v735_v10 = vld [vmem:[#allocation10 + $0xe0] sm:$0xf]  ;;  %v796_v11 = vld [vmem:[#allocation10 + $0xe4] sm:$0xf0]  ;;  %v664_v15 = vor.u32 %v778_v7, %v663_v6 }
  0x29   :  { %486 = vmatpush.bf16.msrb.mxu0 %v744_v4  ;;  %v736_v12 = vor.u32 %v796_v11, %v735_v10  ;;  %v795_v13 = vld [vmem:[#allocation10 + $0xe4] sm:$0xf]  ;;  %v737_v14 = vld [vmem:[#allocation10 + $0xe8] sm:$0xf0]  ;;  %v655_v17 = vld [vmem:[#allocation10 + $0x40] sm:$0xf]  ;;  %v668_v19 = vor.u32 %v777_v8, %v665_v9 }
  0x2a   :  { %474 = vmatpush.bf16.msra.mxu3 %v672_v63  ;;  %v740_v16 = vor.u32 %v795_v13, %v737_v14  ;;  %v776_v18 = vld [vmem:[#allocation10 + $0x44] sm:$0xf0]  ;;  %v727_v20 = vld [vmem:[#allocation10 + $0xd0] sm:$0xf]  ;;  %v794_v21 = vld [vmem:[#allocation10 + $0xd4] sm:$0xf0] }
  0x2b   :  { %250 = vmatpush.bf16.msra.mxu1 %v584_v32  ;;  %v793_v22 = vld [vmem:[#allocation10 + $0xd4] sm:$0xf]  ;;  %v775_v23 = vld [vmem:[#allocation10 + $0x44] sm:$0xf]  ;;  %v657_v24 = vld [vmem:[#allocation10 + $0x48] sm:$0xf0]  ;;  %v728_v26 = vor.u32 %v794_v21, %v727_v20  ;;  %v656_v29 = vor.u32 %v776_v18, %v655_v17 }
  0x2c   :  { %263 = vmatpush.bf16.msra.mxu2 %v588_v33  ;;  %v729_v25 = vld [vmem:[#allocation10 + $0xd8] sm:$0xf0]  ;;  %v719_v28 = vld [vmem:[#allocation10 + $0xc0] sm:$0xf]  ;;  %v792_v30 = vld [vmem:[#allocation10 + $0xc4] sm:$0xf0]  ;;  %v660_v33 = vor.u32 %v775_v23, %v657_v24 }
  0x2d   :  { %487 = vmatpush.bf16.msrb.mxu0 %v736_v12  ;;  %v732_v27 = vor.u32 %v793_v22, %v729_v25  ;;  %v791_v31 = vld [vmem:[#allocation10 + $0xc4] sm:$0xf]  ;;  %v721_v32 = vld [vmem:[#allocation10 + $0xc8] sm:$0xf0]  ;;  %v647_v34 = vld [vmem:[#allocation10 + $0x30] sm:$0xf] }
  0x2e   :  { %475 = vmatpush.bf16.msra.mxu3 %v664_v15  ;;  %v774_v35 = vld [vmem:[#allocation10 + $0x34] sm:$0xf0]  ;;  %v773_v36 = vld [vmem:[#allocation10 + $0x34] sm:$0xf]  ;;  %v649_v37 = vld [vmem:[#allocation10 + $0x38] sm:$0xf0] }
  0x2f   :  { %251 = vmatpush.bf16.msra.mxu1 %v576_v38  ;;  %v720_v38 = vor.u32 %v792_v30, %v719_v28  ;;  %v711_v40 = vld [vmem:[#allocation10 + $0xb0] sm:$0xf]  ;;  %v648_v41 = vor.u32 %v774_v35, %v647_v34  ;;  %v790_v42 = vld [vmem:[#allocation10 + $0xb4] sm:$0xf0]  ;;  %v713_v44 = vld [vmem:[#allocation10 + $0xb8] sm:$0xf0] }
  0x30   :  { %264 = vmatpush.bf16.msra.mxu2 %v580_v39  ;;  %v724_v39 = vor.u32 %v791_v31, %v721_v32  ;;  %v639_v46 = vld [vmem:[#allocation10 + $0x20] sm:$0xf]  ;;  %v772_v47 = vld [vmem:[#allocation10 + $0x24] sm:$0xf0]  ;;  %v771_v48 = vld [vmem:[#allocation10 + $0x24] sm:$0xf]  ;;  %v712_v50 = vor.u32 %v790_v42, %v711_v40 }
  0x31   :  { %488 = vmatpush.bf16.msrb.mxu0 %v728_v26  ;;  %v640_v52 = vor.u32 %v772_v47, %v639_v46  ;;  %v809_v54 = vld [vmem:[#allocation7] ss:$0 sm:$0xff]  ;;  %v631_v60 = vld [vmem:[#allocation10 + $0x10] sm:$0xf]  ;;  %v770_v61 = vld [vmem:[#allocation10 + $0x14] sm:$0xf0] }
  0x32   :  { %476 = vmatpush.bf16.msra.mxu3 %v656_v29  ;;  %v769_v62 = vld [vmem:[#allocation10 + $0x14] sm:$0xf]  ;;  %v632_v63 = vor.u32 %v770_v61, %v631_v60  ;;  %v633_v0 = vld [vmem:[#allocation10 + $0x18] sm:$0xf0]  ;;  %v703_v2 = vld [vmem:[#allocation10 + $0xa0] sm:$0xf] }
  0x33   :  { %252 = vmatpush.bf16.msra.mxu1 %v568_v43  ;;  %v789_v43 = vld [vmem:[#allocation10 + $0xb4] sm:$0xf]  ;;  %v636_v1 = vor.u32 %v769_v62, %v633_v0  ;;  %v787_v4 = vld [vmem:[#allocation10 + $0xa4] sm:$0xf]  ;;  %v705_v6 = vld [vmem:[#allocation10 + $0xa8] sm:$0xf0] }
  0x34   :  { %265 = vmatpush.bf16.msra.mxu2 %v572_v45  ;;  %v652_v45 = vor.u32 %v773_v36, %v649_v37  ;;  %v708_v7 = vor.u32 %v787_v4, %v705_v6  ;;  %v623_v8 = vld [vmem:[#allocation10] sm:$0xf]  ;;  %v768_v9 = vld [vmem:[#allocation10 + $0x4] sm:$0xf0]  ;;  %v767_v10 = vld [vmem:[#allocation10 + $0x4] sm:$0xf] }
  0x35   :  { %489 = vmatpush.bf16.msrb.mxu0 %v720_v38  ;;  %v624_v11 = vor.u32 %v768_v9, %v623_v8  ;;  %v625_v12 = vld [vmem:[#allocation10 + $0x8] sm:$0xf0]  ;;  %v695_v14 = vld [vmem:[#allocation10 + $0x90] sm:$0xf]  ;;  %v786_v15 = vld [vmem:[#allocation10 + $0x94] sm:$0xf0] }
  0x36   :  { %477 = vmatpush.bf16.msra.mxu3 %v648_v41  ;;  %v628_v13 = vor.u32 %v767_v10, %v625_v12  ;;  %v785_v17 = vld [vmem:[#allocation10 + $0x94] sm:$0xf]  ;;  %v697_v18 = vld [vmem:[#allocation10 + $0x98] sm:$0xf0]  ;;  %v687_v20 = vld [vmem:[#allocation10 + $0x80] sm:$0xf] }
  0x37   :  { %253 = vmatpush.bf16.msra.mxu1 %v560_v49  ;;  %v641_v49 = vld [vmem:[#allocation10 + $0x28] sm:$0xf0]  ;;  %v784_v21 = vld [vmem:[#allocation10 + $0x84] sm:$0xf0]  ;;  %v783_v22 = vld [vmem:[#allocation10 + $0x84] sm:$0xf] }
  0x38   :  { %266 = vmatpush.bf16.msra.mxu2 %v564_v51  ;;  %v716_v51 = vor.u32 %v789_v43, %v713_v44  ;;  %v644_v53 = vor.u32 %v771_v48, %v641_v49  ;;  %v688_v23 = vor.u32 %v784_v21, %v687_v20  ;;  %v689_v24 = vld [vmem:[#allocation10 + $0x88] sm:$0xf0]  ;;  %v103_v26 = vld [vmem:[%s1044_s4] sm:$0x3]  ;;  %s975_s4 = smov [#allocation11]  }
  0x39   :  { %490 = vmatpush.bf16.msrb.mxu0 %v712_v50  ;;  %v692_v25 = vor.u32 %v783_v22, %v689_v24  ;;  %v163_v31 = vperm.slane %v103_v26, 1  ;;  %v104_v40 = vld [vmem:[%s1046_s6] sm:$0x3]  ;;  %s534_s29 = sshll.u32 %s975_s4, 4  ;;  %s536_s6 = sshll.u32 %s1047_s7, 4  ;;  %s535_s29 = int_to_ptr.vmem [resolvable:$true] %s534_s29  ;;  %s537_s6 = int_to_ptr.hbm [resolvable:$true] %s536_s6 }
  0x3a   :  { %478 = vmatpush.bf16.msra.mxu3 %v640_v52  ;;  %v309_v41 = vperm.slane %v104_v40, 0  ;;  %v310_v44 = vperm.slane %v104_v40, 1 }
  0x3b   :  { %499 = vmatpush.bf16.msrb.mxu1 %v684_v59 }
  0x3c   :  { %512 = vmatpush.bf16.msrb.mxu2 %v748_v5 }
  0x3e   :  { %479 = vmatpush.bf16.msra.mxu3 %v632_v63 }
  0x3f   :  { %500 = vmatpush.bf16.msrb.mxu1 %v676_v3  ;;  %v788_v3 = vld [vmem:[#allocation10 + $0xa4] sm:$0xf0] }
  0x40   :  { %513 = vmatpush.bf16.msrb.mxu2 %v740_v16  ;;  %v704_v5 = vor.u32 %v788_v3, %v703_v2  ;;  %v696_v16 = vor.u32 %v786_v15, %v695_v14 }
  0x42   :  { %491 = vmatpush.bf16.msrb.mxu0 %v704_v5  ;;  %480 = vmatpush.bf16.msra.mxu3 %v624_v11 }
  0x43   :  { %501 = vmatpush.bf16.msrb.mxu1 %v668_v19  ;;  %v700_v19 = vor.u32 %v785_v17, %v697_v18 }
  0x44   :  { %514 = vmatpush.bf16.msrb.mxu2 %v732_v27  ;;  %v162_v27 = vperm.slane %v103_v26, 0 }
  0x46   :  { %492 = vmatpush.bf16.msrb.mxu0 %v696_v16 }
  0x47   :  { %502 = vmatpush.bf16.msrb.mxu1 %v660_v33 }
  0x48   :  { %515 = vmatpush.bf16.msrb.mxu2 %v724_v39 }
  0x4a   :  { %493 = vmatpush.bf16.msrb.mxu0 %v688_v23 }
  0x4b   :  { %503 = vmatpush.bf16.msrb.mxu1 %v652_v45 }
  0x4c   :  { %516 = vmatpush.bf16.msrb.mxu2 %v716_v51 }
  0x4f   :  { %504 = vmatpush.bf16.msrb.mxu1 %v644_v53 }
  0x50   :  { %517 = vmatpush.bf16.msrb.mxu2 %v708_v7 }
  0x53   :  { %505 = vmatpush.bf16.msrb.mxu1 %v636_v1 }
  0x54   :  { %518 = vmatpush.bf16.msrb.mxu2 %v700_v19 }
  0x57   :  { %506 = vmatpush.bf16.msrb.mxu1 %v628_v13 }
  0x58   :  { %519 = vmatpush.bf16.msrb.mxu2 %v692_v25 }
  0x9c   :  { %v139_v55 = vpop.f32.mrf.mxu0 }
  0x9d   :  { %v140_v56 = vadd.f32 %v809_v54, %v139_v55 }
  0x9f   :  { %v143_v57 = vmax.f32 %v140_v56, 0.0 }
  0xa1   :  { %v144_v58 = vpack.c.bf16 %v143_v57, %v143_v57 }
  0xa3   :  { %254 = vmatmul.bf16.vlgmr.msra.gmra.mxu1 %v144_v58  ;;  %267 = vmatmul.bf16.vlgmr.msra.gmra.mxu2 %v144_v58 }
  0xa4   :  { %v141_v59 = vpop.f32.mrf.mxu0 }
 0x120   :  { %v255_v28 = vpop.f32.mrf.mxu1 }
 0x121   :  { %v256_v29 = vadd.f32 %v255_v28, %v162_v27 }
 0x123   :  { %v272_v30 = vmax.f32 %v256_v29, 0.0 }
 0x125   :  { %v274_v32 = vpack.c.bf16 %v272_v30, %v272_v30 }
 0x126   :  { %v268_v33 = vpop.f32.mrf.mxu2 }
 0x127   :  { %v269_v34 = vadd.f32 %v268_v33, %v163_v31  ;;  %481 = vmatmul.bf16.vlgmr.msra.gmra.mxu3 %v274_v32  ;;  %507 = vmatmul.bf16.vlgmr.msrb.gmra.mxu1 %v274_v32 }
 0x128   :  { %v257_v35 = vpop.f32.mrf.mxu1 }
 0x129   :  { %v273_v36 = vmax.f32 %v269_v34, 0.0 }
 0x12b   :  { %v275_v37 = vpack.c.bf16 %v273_v36, %v273_v36 }
 0x12d   :  { %494 = vmatmul.bf16.vlgmr.msrb.gmra.mxu0 %v275_v37  ;;  %520 = vmatmul.bf16.vlgmr.msrb.gmra.mxu2 %v275_v37 }
 0x12e   :  { %v270_v38 = vpop.f32.mrf.mxu2 }
 0x1a4   :  { %v508_v39 = vpop.f32.mrf.mxu1 }
 0x1a5   :  { %v509_v48 = vadd.f32 %v508_v39, %v310_v44 }
 0x1aa   :  { %v482_v42 = vpop.f32.mrf.mxu3  ;;  %v495_v43 = vpop.f32.mrf.mxu0 }
 0x1ab   :  { %v483_v45 = vadd.f32 %v482_v42, %v309_v41 }
 0x1ac   :  { %v510_v46 = vpop.f32.mrf.mxu1 }
 0x1ad   :  { %v496_v47 = vadd.f32 %v495_v43, %v483_v45 }
 0x1af   :  { %810 = vtanh.f32 %v496_v47 }
 0x1b0   :  { %v521_v49 = vpop.f32.mrf.mxu2 }
 0x1b1   :  { %v522_v50 = vadd.f32 %v521_v49, %v509_v48 }
 0x1b2   :  { %v484_v51 = vpop.f32.mrf.mxu3  ;;  %v497_v52 = vpop.f32.mrf.mxu0 }
 0x1b3   :  { %812 = vtanh.f32 %v522_v50 }
 0x1b5   :  { %v811_v53 = vpop.eup %810 }
 0x1b6   :  { %527 = vst [vmem:[#allocation11] sm:$0xff] %v811_v53 }
 0x1b8   :  { %v523_v54 = vpop.f32.mrf.mxu2 }
 0x1b9   :  { %v813_v55 = vpop.eup %812 }
 0x1ba   :  { %528 = vst [vmem:[#allocation11 + $0x8] sm:$0xff] %v813_v55 }
 0x1bb   :  { %539 = dma.vmem_to_hbm [thread:$0]  %s535_s29, 256, %s537_s6, [#allocation4]  }
 0x1bc   :  { %964 = dma.done.wait [#allocation4], 256  }
 0x1bd   :  { %965 = vsyncadd [#allocation4], 4294967040 }
 0x1be   :  { %544 = vsyncpa [#allocation3], 1 }
 0x1bf   :  { %545 = vsyncpa [#allocation6], 1 }
 0x1c0   :  { %546 = vsyncpa [#allocation9], 1 }
 0x1c1   :  { %547 = vsyncpa [#allocation4], 1 }

</bundles_post_ra>
